<compile_context>
chip_gen: v7x
topology: tpu7x:2x2x1
jax: 0.10.0
libtpu: 0.0.40
codegen_flags: <defaults>
</compile_context>

<pallas_src>
import functools

import jax
import jax.numpy as jnp
from jax.experimental import pallas as pl
from jax.experimental.pallas import tpu as pltpu


def _round_up(x, m):
    return ((x + m - 1) // m) * m


def _cdiv(a, b):
    return (a + b - 1) // b


def _joints_mse_body(pred_ref, gt_ref, w_ref, out_ref, *, rows, tile_r, w_resident):
    """Per-tile partial sums of (w*(pred-gt))^2 folded over rows into (8, P)."""
    i = pl.program_id(0)
    d = pred_ref[...].astype(jnp.float32) - gt_ref[...].astype(jnp.float32)
    sq = d * d                                                   # (tile_r, P), VPU

    if w_ref is not None:
        if w_resident:
            # Whole weight is resident in VMEM; slice this tile's rows.
            start = pl.multiple_of(i * tile_r, 8)
            w = w_ref[pl.ds(start, tile_r), :].astype(jnp.float32)   # (tile_r, 1)
        else:
            w = w_ref[...].astype(jnp.float32)                        # (tile_r, 1)
        # Broadcast w^2 over P: VPU has full slack under the DMA stream.
        sq = sq * (w * w)

    # Mask rows past the logical B*J extent (last, partial tile). Select, not
    # multiply-by-zero, so padded-row garbage (possibly Inf/NaN) is dropped.
    row_ids = i * tile_r + jax.lax.broadcasted_iota(jnp.int32, (tile_r, 1), 0)
    sq = jnp.where(row_ids < rows, sq, 0.0)

    # Lane-dense partial: fold groups of 8 rows together with plain vreg adds
    # (no cross-lane XLU reduce); (8, P) block stores as full, unmasked vst.
    p = sq.shape[-1]
    out_ref[...] = jnp.sum(sq.reshape(tile_r // 8, 8, p), axis=0)


def _joints_mse_kernel_weighted(pred_ref, gt_ref, w_ref, out_ref, *, rows, tile_r,
                                w_resident):
    _joints_mse_body(pred_ref, gt_ref, w_ref, out_ref, rows=rows, tile_r=tile_r,
                     w_resident=w_resident)


def _joints_mse_kernel_unweighted(pred_ref, gt_ref, out_ref, *, rows, tile_r):
    _joints_mse_body(pred_ref, gt_ref, None, out_ref, rows=rows, tile_r=tile_r,
                     w_resident=False)


def joints_mse_loss(output, target, target_weight=None, *, use_target_weight=True,
                    gamma=0.5, focal_loss_enable=False, focal_temp=1.0):
    """output/target: (B, J, H, W); target_weight: (B, J, 1) (PyTorch convention).

    Computes sum_j 0.5 * mean_{b,p}((w[b,j]*(pred - gt))^2) / J, which equals
    0.5 * sum_{b,j,p}(w*(pred-gt))^2 / (B*J*P) since every per-joint mean has
    the same denominator B*P.

    Note: in the reference module, `gamma`/`focal_temp` only affect the
    focal-loss branch (torch.pow(dist, gamma) re-weighting); they do NOT scale
    the plain-MSE path — its 0.5 factor is hard-coded in the PyTorch source.
    """
    # TODO(synk): focal_loss_enable branch (per-joint argmax-distance
    # re-weighting + softmax over the batch axis) is not implemented.
    assert not focal_loss_enable, "focal loss path not implemented"
    del gamma, focal_temp  # only used by the (unimplemented) focal branch

    B, J, H, W = output.shape
    assert target.shape == output.shape
    P = H * W
    rows = B * J

    # Keep the HBM dtype (bf16 stays bf16 — this loss is purely HBM-bandwidth
    # bound, so halving bytes moved halves wall time); cast to f32 in-kernel.
    pred = output.reshape(rows, P)
    gt = target.reshape(rows, P)
    itemsize = pred.dtype.itemsize
    p_pad = _round_up(P, 128)          # lane-padded VMEM width
    rows8 = _round_up(rows, 8)

    # ---- Tile sizing from byte budgets -------------------------------------
    target_read_bytes = 16 << 20       # >= ~16 MiB of input read per grid step
    input_vmem_budget = 44 << 20       # 2 inputs x 2 buffers; fits v7x 64 MiB VMEM
    bytes_per_row_read = 2 * P * itemsize
    bytes_per_row_vmem = 2 * 2 * p_pad * itemsize
    tile_from_target = max(8, target_read_bytes // bytes_per_row_read)
    tile_from_vmem = max(8, input_vmem_budget // bytes_per_row_vmem)
    tile_r = min(rows8, tile_from_target, tile_from_vmem)
    tile_r = max(8, (tile_r // 8) * 8)

    num_tiles = _cdiv(rows, tile_r)
    # Megacore (v7x has 2 TensorCores): make sure a non-trivial problem has
    # >= 2 tiles so the "parallel" grid axis can actually split across cores.
    if num_tiles == 1 and rows8 >= 16 and rows * bytes_per_row_read > (4 << 20):
        tile_r = _round_up(_cdiv(rows8, 2), 8)
        num_tiles = _cdiv(rows, tile_r)
    padded_rows = num_tiles * tile_r

    in_specs = [
        pl.BlockSpec((tile_r, P), lambda i: (i, 0)),
        pl.BlockSpec((tile_r, P), lambda i: (i, 0)),
    ]
    operands = [pred, gt]
    w_vmem_bytes = 0

    if use_target_weight:
        assert target_weight is not None
        w = target_weight.reshape(rows, 1).astype(jnp.float32)
        if padded_rows != rows:
            w = jnp.pad(w, ((0, padded_rows - rows), (0, 0)))
        # Resident weight (constant block index -> one DMA, stays in VMEM) as
        # long as its lane-padded copy is small (rows is normally just B*J).
        w_resident = padded_rows * 128 * 4 <= (4 << 20)
        if w_resident:
            in_specs.append(pl.BlockSpec((padded_rows, 1), lambda i: (0, 0)))
            w_vmem_bytes = 2 * padded_rows * 128 * 4
        else:
            in_specs.append(pl.BlockSpec((tile_r, 1), lambda i: (i, 0)))
            w_vmem_bytes = 2 * tile_r * 128 * 4
        operands.append(w)
        kernel = functools.partial(_joints_mse_kernel_weighted, rows=rows,
                                   tile_r=tile_r, w_resident=w_resident)
        flops = 5 * rows * P
    else:
        kernel = functools.partial(_joints_mse_kernel_unweighted, rows=rows,
                                   tile_r=tile_r)
        flops = 3 * rows * P

    out_rows = num_tiles * 8

    # Explicit scoped-VMEM limit: default is ~16 MiB on v5e / ~32 MiB on
    # v6e/v7x; the large tiles above need it raised. Clamp at 60 MiB so it is
    # always valid on v7x (64 MiB VMEM per TensorCore).
    vmem_need = (2 * 2 * tile_r * p_pad * itemsize      # pred/gt double-buffered
                 + 2 * 8 * p_pad * 4                    # output double-buffered
                 + w_vmem_bytes)                        # resident/per-tile weight
    vmem_limit = int(min(max(int(vmem_need * 1.25) + (2 << 20), 32 << 20), 60 << 20))

    bytes_accessed = (2 * rows * P * itemsize
                      + (padded_rows * 4 if use_target_weight else 0)
                      + out_rows * P * 4)

    partials = pl.pallas_call(
        kernel,
        out_shape=jax.ShapeDtypeStruct((out_rows, P), jnp.float32),
        grid=(num_tiles,),
        in_specs=in_specs,
        out_specs=pl.BlockSpec((8, P), lambda i: (i, 0)),
        compiler_params=pltpu.CompilerParams(
            dimension_semantics=("parallel",),
            vmem_limit_bytes=vmem_limit),
        cost_estimate=pl.CostEstimate(
            flops=int(flops),
            transcendentals=0,
            bytes_accessed=int(bytes_accessed)),
    )(*operands)

    # Tiny finalize (num_tiles*8 x P elements): one XLA reduce plus the global
    # 0.5 / (B*J*P) scale applied exactly once.
    return jnp.sum(partials) * (0.5 / float(rows * P))


def _reference_loss(output, target, target_weight, use_target_weight=True):
    """Pure-JAX replica of the PyTorch forward (no focal loss)."""
    B, J, H, W = output.shape
    pred = output.reshape(B, J, H * W).astype(jnp.float32)
    gt = target.reshape(B, J, H * W).astype(jnp.float32)
    if use_target_weight:
        w = target_weight.reshape(B, J, 1).astype(jnp.float32)
        per_joint = jnp.mean(((pred - gt) * w) ** 2, axis=(0, 2))   # (J,)
    else:
        per_joint = jnp.mean((pred - gt) ** 2, axis=(0, 2))
    return jnp.sum(0.5 * per_joint) / J


if __name__ == "__main__":
    key = jax.random.PRNGKey(0)
    k1, k2, k3 = jax.random.split(key, 3)

    # Case 1: canonical small shape, f32, P = 256 (multiple of 128).
    B, J, H, W = 2, 4, 16, 16
    output = jax.random.normal(k1, (B, J, H, W), dtype=jnp.float32)
    target = jax.random.normal(k2, (B, J, H, W), dtype=jnp.float32)
    target_weight = jax.random.uniform(k3, (B, J, 1), dtype=jnp.float32)

    loss_w = jax.block_until_ready(
        joints_mse_loss(output, target, target_weight, use_target_weight=True))
    ref_w = jax.block_until_ready(
        _reference_loss(output, target, target_weight, True))
    assert jnp.allclose(loss_w, ref_w, rtol=1e-5, atol=1e-6), (loss_w, ref_w)

    loss_nw = jax.block_until_ready(
        joints_mse_loss(output, target, None, use_target_weight=False))
    ref_nw = jax.block_until_ready(
        _reference_loss(output, target, None, False))
    assert jnp.allclose(loss_nw, ref_nw, rtol=1e-5, atol=1e-6), (loss_nw, ref_nw)

    # Case 2: P = H*W not a multiple of 128 and rows not a multiple of 8
    # (exercises the full-array-dim lane block and the row-tail masking).
    k4, k5, k6 = jax.random.split(jax.random.PRNGKey(1), 3)
    B2, J2, H2, W2 = 3, 17, 12, 20                  # rows = 51, P = 240
    out2 = jax.random.normal(k4, (B2, J2, H2, W2), dtype=jnp.float32)
    tgt2 = jax.random.normal(k5, (B2, J2, H2, W2), dtype=jnp.float32)
    tw2 = jax.random.uniform(k6, (B2, J2, 1), dtype=jnp.float32)
    loss2 = jax.block_until_ready(
        joints_mse_loss(out2, tgt2, tw2, use_target_weight=True))
    ref2 = jax.block_until_ready(_reference_loss(out2, tgt2, tw2, True))
    assert jnp.allclose(loss2, ref2, rtol=1e-5, atol=1e-6), (loss2, ref2)

    # Case 3: bf16 heatmaps (no wrapper upcast -> half the HBM bytes moved).
    out_bf = output.astype(jnp.bfloat16)
    tgt_bf = target.astype(jnp.bfloat16)
    loss_bf = jax.block_until_ready(
        joints_mse_loss(out_bf, tgt_bf, target_weight, use_target_weight=True))
    ref_bf = jax.block_until_ready(
        _reference_loss(out_bf, tgt_bf, target_weight, True))
    assert jnp.allclose(loss_bf, ref_bf, rtol=2e-3, atol=1e-5), (loss_bf, ref_bf)

    print("KERNEL_OK")
</pallas_src>

<mosaic_0001>
module attributes {stable_mosaic.version = 11 : i64} {
  func.func @_joints_mse_kernel_weighted(%arg0: i32, %arg1: memref<8x256xf32, #tpu.memory_space<vmem>>, %arg2: memref<8x256xf32, #tpu.memory_space<vmem>>, %arg3: memref<8x1xf32, #tpu.memory_space<vmem>>, %arg4: memref<8x256xf32, #tpu.memory_space<vmem>>) attributes {dimension_semantics = [#tpu.dimension_semantics<parallel>], iteration_bounds = array<i64: 1>, scalar_prefetch = 0 : i64, scratch_operands = 0 : i64, tpu.core_type = #tpu.core_type<tc>, window_params = [{transform_indices = @transform_0, window_bounds = array<i64: 8, 256>}, {transform_indices = @transform_1, window_bounds = array<i64: 8, 256>}, {pipeline_mode = #tpu.pipeline_mode<synchronous>, transform_indices = @transform_2, window_bounds = array<i64: 8, 1>}, {transform_indices = @transform_3, window_bounds = array<i64: 8, 256>}]} {
    %c0 = arith.constant 0 : index
    %c0_0 = arith.constant 0 : index
    %0 = vector.load %arg1[%c0, %c0_0] : memref<8x256xf32, #tpu.memory_space<vmem>>, vector<8x256xf32>
    %c0_1 = arith.constant 0 : index
    %c0_2 = arith.constant 0 : index
    %1 = vector.load %arg2[%c0_1, %c0_2] : memref<8x256xf32, #tpu.memory_space<vmem>>, vector<8x256xf32>
    %2 = arith.subf %0, %1 : vector<8x256xf32>
    %3 = arith.mulf %2, %2 : vector<8x256xf32>
    %c8_i32 = arith.constant 8 : i32
    %4 = arith.muli %arg0, %c8_i32 : i32
    %5 = tpu.assume_multiple %4, 8 : i32
    %6 = arith.index_cast %5 : i32 to index
    %c0_3 = arith.constant 0 : index
    %7 = vector.load %arg3[%6, %c0_3] : memref<8x1xf32, #tpu.memory_space<vmem>>, vector<8x1xf32>
    %8 = arith.mulf %7, %7 : vector<8x1xf32>
    %9 = vector.broadcast %8 : vector<8x1xf32> to vector<8x256xf32>
    %10 = arith.mulf %3, %9 : vector<8x256xf32>
    %c8_i32_4 = arith.constant 8 : i32
    %11 = arith.muli %arg0, %c8_i32_4 : i32
    %12 = tpu.iota {dimensions = array<i32: 0>} : vector<8x1xi32>
    %13 = vector.broadcast %11 : i32 to vector<8x1xi32>
    %14 = arith.addi %13, %12 : vector<8x1xi32>
    %c8_i32_5 = arith.constant 8 : i32
    %15 = vector.broadcast %c8_i32_5 : i32 to vector<8x1xi32>
    %16 = arith.cmpi slt, %14, %15 : vector<8x1xi32>
    %cst = arith.constant 0.000000e+00 : f32
    %17 = vector.shape_cast %16 : vector<8x1xi1> to vector<8x1xi1>
    %18 = vector.broadcast %17 : vector<8x1xi1> to vector<8x256xi1>
    %19 = vector.broadcast %cst : f32 to vector<8x256xf32>
    %20 = arith.select %18, %10, %19 : vector<8x256xi1>, vector<8x256xf32>
    %21 = vector.shape_cast %20 : vector<8x256xf32> to vector<1x8x256xf32>
    %cst_6 = arith.constant dense<0.000000e+00> : vector<8x256xf32>
    %22 = vector.multi_reduction <add>, %21, %cst_6 [0] : vector<1x8x256xf32> to vector<8x256xf32>
    %c0_7 = arith.constant 0 : index
    %c0_8 = arith.constant 0 : index
    %23 = vector.load %arg4[%c0_7, %c0_8] : memref<8x256xf32, #tpu.memory_space<vmem>>, vector<8x256xf32>
    tpu.vector_store %arg4[%c0_7, %c0_8], %22 {strides = array<i32>} : memref<8x256xf32, #tpu.memory_space<vmem>>, vector<8x256xf32>,
    return
  }
  func.func @transform_0(%arg0: i32) -> (i32, i32) {
    %c0_i32 = arith.constant 0 : i32
    %c0_i32_0 = arith.constant 0 : i32
    return %arg0, %c0_i32 : i32, i32
  }
  func.func @transform_1(%arg0: i32) -> (i32, i32) {
    %c0_i32 = arith.constant 0 : i32
    %c0_i32_0 = arith.constant 0 : i32
    return %arg0, %c0_i32 : i32, i32
  }
  func.func @transform_2(%arg0: i32) -> (i32, i32) {
    %c0_i32 = arith.constant 0 : i32
    %c0_i32_0 = arith.constant 0 : i32
    %c0_i32_1 = arith.constant 0 : i32
    return %c0_i32, %c0_i32_0 : i32, i32
  }
  func.func @transform_3(%arg0: i32) -> (i32, i32) {
    %c0_i32 = arith.constant 0 : i32
    %c0_i32_0 = arith.constant 0 : i32
    return %arg0, %c0_i32 : i32, i32
  }
}

</mosaic_0001>

<bundles_post_ra>
// kernel: tpu_custom_call.1
= control target key start
LH: loop header
LB: loop body
LE: loop exit
PB: predicated region body
PF: predicated region fallthrough
CT: control target
= control target key end

     0   :  { %8 = vsyncpa [#allocation3], 0  ;;  %s227_s0 = inlined_call_operand.hbm [shape: f32[8,256], index: 0, kind: input, shape index: {}]   ;;  %s228_s1 = inlined_call_operand.hbm [shape: f32[8,256], index: 1, kind: input, shape index: {}]   ;;  %s229_s2 = inlined_call_operand.vmem [shape: f32[8,1], index: 2, kind: input, shape index: {}]   ;;  %s230_s3 = inlined_call_operand.hbm [shape: f32[8,256], index: 3, kind: output, shape index: {}]  }
   0x1   :  { %9 = vsyncpa [#allocation6], 0 }
   0x2   :  { %10 = vsyncpa [#allocation4], 0  ;;  %s164_s12 = smov [#allocation2]   ;;  %s165_s14 = smov [#allocation5]  }
   0x3   :  { %s17_s13 = sshll.u32 %s164_s12, 4  ;;  %s27_s15 = sshll.u32 %s165_s14, 4  ;;  %s18_s13 = int_to_ptr.vmem [resolvable:$true] %s17_s13  ;;  %s28_s15 = int_to_ptr.vmem [resolvable:$true] %s27_s15 }
   0x4   :  { %s92_s18 = scalar_lea.hbm %s227_s0, 256 }
   0x5   :  { %p93_p0 = scmp.ne.s32.totalorder %s227_s0, %s92_s18  ;;  %p96_p1 = scmp.lt.u32.totalorder %s92_s18, %s227_s0 }
   0x7   :  { %p98_p2 = pnand %p96_p1, %p93_p0 }
   0x9   :  { %101 = shalt.err (!%p98_p2)
}
   0xa   :  { %s102_s23 = scalar_lea.vmem %s18_s13, 256  ;;  %p107_p4 = scmp.lt.s32.totalorder %s18_s13, %s18_s13 }
   0xb   :  { %p103_p3 = scmp.ne.s32.totalorder %s18_s13, %s102_s23  ;;  %p108_p5 = scmp.lt.s32.totalorder %s102_s23, %s102_s23 }
   0xd   :  { %p109_p6 = por %p108_p5, %p107_p4 }
   0xf   :  { %p110_p7 = pnand %p109_p6, %p103_p3 }
  0x11   :  { %113 = shalt.err (!%p110_p7)
}
  0x12   :  { %20 = dma.hbm_to_vmem [thread:$0]  %s227_s0, 256, %s18_s13, [#allocation3]  }
  0x13   :  { %s114_s28 = scalar_lea.hbm %s228_s1, 256 }
  0x14   :  { %p115_p8 = scmp.ne.s32.totalorder %s228_s1, %s114_s28  ;;  %p118_p9 = scmp.lt.u32.totalorder %s114_s28, %s228_s1 }
  0x16   :  { %p120_p10 = pnand %p118_p9, %p115_p8 }
  0x18   :  { %123 = shalt.err (!%p120_p10)
}
  0x19   :  { %s124_s6 = scalar_lea.vmem %s28_s15, 256  ;;  %p129_p12 = scmp.lt.s32.totalorder %s28_s15, %s28_s15 }
  0x1a   :  { %p125_p11 = scmp.ne.s32.totalorder %s28_s15, %s124_s6  ;;  %p130_p13 = scmp.lt.s32.totalorder %s124_s6, %s124_s6 }
  0x1c   :  { %p131_p0 = por %p130_p13, %p129_p12 }
  0x1e   :  { %p132_p1 = pnand %p131_p0, %p125_p11 }
  0x20   :  { %135 = shalt.err (!%p132_p1)
}
  0x21   :  { %30 = dma.hbm_to_vmem [thread:$0]  %s228_s1, 256, %s28_s15, [#allocation6]  }
  0x22   :  { %158 = dma.done.wait [#allocation3], 256  }
  0x23   :  { %159 = vsyncadd [#allocation3], 4294967040 }
  0x24   :  { %160 = dma.done.wait [#allocation6], 256  }
  0x25   :  { %161 = vsyncadd [#allocation6], 4294967040  ;;  %v166_v0 = vmov 0   ;;  %v49_v1 = vld [vmem:[%s229_s2] sm:$0xff]  ;;  %v40_v4 = vld [vmem:[#allocation2 + $0x8] sm:$0xff]  ;;  %s167_s1 = smov [#allocation7]  }
  0x26   :  { %91 = vset.pattern.permute.xlu0 %v166_v0  ;;  %v50_v2 = vmul.f32 %v49_v1, %v49_v1  ;;  %v39_v3 = vld [vmem:[#allocation2] sm:$0xff]  ;;  %v41_v5 = vld [vmem:[#allocation5] sm:$0xff]  ;;  %v42_v6 = vld [vmem:[#allocation5 + $0x8] sm:$0xff]  ;;  %s77_s10 = sshll.u32 %s167_s1, 4  ;;  %s78_s10 = int_to_ptr.vmem [resolvable:$true] %s77_s10 }
  0x27   :  { %v43_v7 = vsub.f32 %v39_v3, %v41_v5  ;;  %v44_v8 = vsub.f32 %v40_v4, %v42_v6  ;;  %s136_s11 = scalar_lea.vmem %s78_s10, 256  ;;  %p141_p3 = scmp.lt.s32.totalorder %s78_s10, %s78_s10 }
  0x28   :  { %53 = vperm.xlu0 %91, %v50_v2   ;;  %p137_p2 = scmp.ne.s32.totalorder %s78_s10, %s136_s11  ;;  %p142_p4 = scmp.lt.s32.totalorder %s136_s11, %s136_s11 }
  0x29   :  { %v45_v9 = vmul.f32 %v43_v7, %v43_v7  ;;  %v46_v10 = vmul.f32 %v44_v8, %v44_v8 }
  0x2a   :  { %p143_p5 = por %p142_p4, %p141_p3 }
  0x2c   :  { %p144_p6 = pnand %p143_p5, %p137_p2 }
  0xa7   :  { %v54_v11 = vpop.permute.xlu0 %53 }
  0xa8   :  { %v56_v12 = vmul.f32 %v54_v11, %v45_v9  ;;  %v57_v13 = vmul.f32 %v54_v11, %v46_v10 }
  0xaa   :  { %69 = vst [vmem:[#allocation7] sm:$0xff] %v56_v12  ;;  %70 = vst [vmem:[#allocation7 + $0x8] sm:$0xff] %v57_v13 }
  0xab   :  { %147 = shalt.err (!%p144_p6)
}
  0xac   :  { %s148_s13 = scalar_lea.hbm %s230_s3, 256 }
  0xad   :  { %p149_p7 = scmp.ne.s32.totalorder %s230_s3, %s148_s13  ;;  %p152_p8 = scmp.lt.u32.totalorder %s148_s13, %s230_s3 }
  0xaf   :  { %p154_p9 = pnand %p152_p8, %p149_p7 }
  0xb1   :  { %157 = shalt.err (!%p154_p9)
}
  0xb2   :  { %80 = dma.vmem_to_hbm [thread:$0]  %s78_s10, 256, %s230_s3, [#allocation4]  }
  0xb3   :  { %162 = dma.done.wait [#allocation4], 256  }
  0xb4   :  { %163 = vsyncadd [#allocation4], 4294967040 }
  0xb5   :  { %84 = vsyncpa [#allocation3], 1 }
  0xb6   :  { %85 = vsyncpa [#allocation6], 1 }
  0xb7   :  { %86 = vsyncpa [#allocation4], 1 }

</bundles_post_ra>
